<compile_context>
chip_gen: v6e
topology: v6e:2x2x1
jax: 0.10.0
libtpu: 0.0.40
codegen_flags: <defaults>
</compile_context>

<pallas_src>
import math
import itertools

import jax
import jax.numpy as jnp
import numpy as np
from jax.experimental import pallas as pl
from jax.experimental.pallas import tpu as pltpu


def _get_pad(size: int, multiple: int):
    new_size = math.ceil(size / multiple) * multiple
    pad_size = new_size - size
    pad_left = pad_size // 2
    pad_right = pad_size - pad_left
    return pad_left, pad_right


def _compute_pads(shape, multiple):
    """Pad list for dims shape[:1:-1] (last dim first) — mirrors init_padding."""
    return list(
        itertools.chain.from_iterable(_get_pad(m, multiple) for m in shape[:1:-1])
    )


def _jnp_pad(x: jax.Array, pads) -> jax.Array:
    """jnp.pad equivalent of F.pad(x, pads) (pads: last dim first)."""
    ndim = x.ndim
    widths = [(0, 0)] * ndim
    for i, d in enumerate(range(ndim - 1, 1, -1)):
        widths[d] = (pads[2 * i], pads[2 * i + 1])
    return jnp.pad(x, widths, mode="constant")


def _vmem_capacity_bytes() -> int:
    """Per-TensorCore VMEM capacity; conservative (v7x) if the query fails."""
    try:
        info = pltpu.get_tpu_info()
        cap = getattr(info, "vmem_capacity_bytes", None)
        if cap:
            return int(cap)
    except Exception:
        pass
    return 64 * 1024 * 1024


def _choose_blk(nc: int, per_item_bytes: int, target_bytes: int) -> int:
    """Largest divisor of nc whose (in+out) block fits the target, keeping
    >= 2 grid steps whenever nc permits (megacore on v7x)."""
    best = 1
    for d in range(1, nc + 1):
        if nc % d != 0:
            continue
        if d * per_item_bytes > target_bytes:
            continue
        if nc >= 2 and nc // d < 2:
            continue
        best = max(best, d)
    return best


def center_padding_forward(
    x: jax.Array, multiple: int, *, force_pallas: bool = False
) -> jax.Array:
    """Pallas implementation of CenterPadding.forward."""
    pads = _compute_pads(x.shape, multiple)

    # Fast path: nothing to pad.
    if not pads or all(p == 0 for p in pads):
        return x

    if x.ndim != 4:
        # TODO(synk): Pallas kernel covers the common 4-D NCHW case; other
        # ranks use XLA's native pad (same semantics as F.pad).
        return _jnp_pad(x, pads)

    N, C, H, W = x.shape
    pw_l, pw_r, ph_l, ph_r = pads  # pads[:2] -> W, pads[2:] -> H
    Hn = H + ph_l + ph_r
    Wn = W + pw_l + pw_r

    itemsize = jnp.dtype(x.dtype).itemsize
    per_item_bytes = (H * W + Hn * Wn) * itemsize  # one (H,W)+(Hn,Wn) plane

    vmem_cap = _vmem_capacity_bytes()
    vmem_budget = vmem_cap - 8 * 1024 * 1024  # headroom for compiler scratch

    too_big = 2 * per_item_bytes > vmem_budget  # even blk=1, double-buffered
    lane_sparse = Wn < 128                      # <1 vreg lane width -> masked I/O

    if too_big or (lane_sparse and not force_pallas):
        # XLA's pad is at (or above) the rate the Pallas path could reach here.
        return _jnp_pad(x, pads)

    NC = N * C
    target_block_bytes = vmem_cap // 6  # double-buffered in+out <= vmem/3
    blk = _choose_blk(NC, per_item_bytes, target_block_bytes)
    block_bytes = blk * per_item_bytes
    vmem_limit = int(
        min(max(2 * block_bytes + 4 * 1024 * 1024, 32 * 1024 * 1024), vmem_budget)
    )

    x_flat = x.reshape(NC, H, W)  # fuse N and C (contiguous, free reshape)

    def kernel(x_ref, o_ref):
        # Build the padded block entirely in registers, then store the whole
        # tile once (single unmasked, tile-aligned store stream).
        blk_x = x_ref[...]  # (blk, H, W)
        if pw_l > 0 or pw_r > 0:
            parts = []
            if pw_l > 0:
                parts.append(jnp.zeros((blk, H, pw_l), o_ref.dtype))
            parts.append(blk_x)
            if pw_r > 0:
                parts.append(jnp.zeros((blk, H, pw_r), o_ref.dtype))
            blk_x = jnp.concatenate(parts, axis=2)  # (blk, H, Wn)
        if ph_l > 0 or ph_r > 0:
            parts = []
            if ph_l > 0:
                parts.append(jnp.zeros((blk, ph_l, Wn), o_ref.dtype))
            parts.append(blk_x)
            if ph_r > 0:
                parts.append(jnp.zeros((blk, ph_r, Wn), o_ref.dtype))
            blk_x = jnp.concatenate(parts, axis=1)  # (blk, Hn, Wn)
        o_ref[...] = blk_x

    out_flat = pl.pallas_call(
        kernel,
        out_shape=jax.ShapeDtypeStruct((NC, Hn, Wn), x.dtype),
        grid=(NC // blk,),
        in_specs=[pl.BlockSpec((blk, H, W), lambda i: (i, 0, 0))],
        out_specs=pl.BlockSpec((blk, Hn, Wn), lambda i: (i, 0, 0)),
        compiler_params=pltpu.CompilerParams(
            dimension_semantics=("parallel",),
            vmem_limit_bytes=vmem_limit,
        ),
        cost_estimate=pl.CostEstimate(
            flops=0,
            transcendentals=0,
            bytes_accessed=NC * per_item_bytes,
        ),
    )(x_flat)

    return out_flat.reshape(N, C, Hn, Wn)


def center_padding_reference(x: jax.Array, multiple: int) -> jax.Array:
    """Pure-JAX reference mirroring F.pad(x, pad) with center padding."""
    pads = _compute_pads(x.shape, multiple)
    if not pads or all(p == 0 for p in pads):
        return x
    return _jnp_pad(x, pads)


if __name__ == "__main__":
    multiple = 14  # DINOv2 patch-size-style multiple
    key = jax.random.PRNGKey(0)

    # Case 1: small NCHW (16 -> 28 in both spatial dims). The default dispatch
    # sends lane-sparse (Wn < 128) inputs to jnp.pad, so also force the Pallas
    # path to validate the kernel itself.
    x = jax.random.normal(key, (2, 4, 16, 16), dtype=jnp.float32)
    ref = center_padding_reference(x, multiple)

    out_pallas = jax.block_until_ready(
        center_padding_forward(x, multiple, force_pallas=True)
    )
    np.testing.assert_allclose(np.asarray(out_pallas), np.asarray(ref), rtol=0, atol=0)
    assert out_pallas.shape == (2, 4, 28, 28)

    out_default = jax.block_until_ready(center_padding_forward(x, multiple))
    np.testing.assert_allclose(np.asarray(out_default), np.asarray(ref), rtol=0, atol=0)

    # Case 2: lane-dense input (Wn >= 128) that takes the Pallas path by default.
    x2 = jax.random.normal(key, (2, 3, 120, 130), dtype=jnp.float32)
    out2 = jax.block_until_ready(center_padding_forward(x2, multiple))
    ref2 = center_padding_reference(x2, multiple)
    np.testing.assert_allclose(np.asarray(out2), np.asarray(ref2), rtol=0, atol=0)
    assert out2.shape == (2, 3, 126, 140)

    # Case 3: spatial dims already multiples of `multiple` -> identity fast path.
    x3 = jax.random.normal(key, (2, 4, 28, 28), dtype=jnp.float32)
    out3 = jax.block_until_ready(center_padding_forward(x3, multiple))
    np.testing.assert_allclose(np.asarray(out3), np.asarray(x3), rtol=0, atol=0)

    print("KERNEL_OK")
</pallas_src>

<mosaic_0001>
module attributes {stable_mosaic.version = 11 : i64} {
  func.func @kernel(%arg0: i32, %arg1: memref<4x16x16xf32, #tpu.memory_space<vmem>>, %arg2: memref<4x28x28xf32, #tpu.memory_space<vmem>>) attributes {dimension_semantics = [#tpu.dimension_semantics<parallel>], iteration_bounds = array<i64: 2>, scalar_prefetch = 0 : i64, scratch_operands = 0 : i64, tpu.core_type = #tpu.core_type<tc>, window_params = [{transform_indices = @transform_0, window_bounds = array<i64: 4, 16, 16>}, {transform_indices = @transform_1, window_bounds = array<i64: 4, 28, 28>}]} {
    %c0 = arith.constant 0 : index
    %c0_0 = arith.constant 0 : index
    %c0_1 = arith.constant 0 : index
    %0 = vector.load %arg1[%c0, %c0_0, %c0_1] : memref<4x16x16xf32, #tpu.memory_space<vmem>>, vector<4x16x16xf32>
    %cst = arith.constant 0.000000e+00 : f32
    %1 = vector.broadcast %cst : f32 to vector<4x16x6xf32>
    %cst_2 = arith.constant 0.000000e+00 : f32
    %2 = vector.broadcast %cst_2 : f32 to vector<4x16x6xf32>
    %3 = tpu.concatenate %1, %0, %2 in 2 : vector<4x16x6xf32>, vector<4x16x16xf32>, vector<4x16x6xf32> -> vector<4x16x28xf32>
    %cst_3 = arith.constant 0.000000e+00 : f32
    %4 = vector.broadcast %cst_3 : f32 to vector<4x6x28xf32>
    %cst_4 = arith.constant 0.000000e+00 : f32
    %5 = vector.broadcast %cst_4 : f32 to vector<4x6x28xf32>
    %6 = tpu.concatenate %4, %3, %5 in 1 : vector<4x6x28xf32>, vector<4x16x28xf32>, vector<4x6x28xf32> -> vector<4x28x28xf32>
    %c0_5 = arith.constant 0 : index
    %c0_6 = arith.constant 0 : index
    %c0_7 = arith.constant 0 : index
    %7 = vector.load %arg2[%c0_5, %c0_6, %c0_7] : memref<4x28x28xf32, #tpu.memory_space<vmem>>, vector<4x28x28xf32>
    tpu.vector_store %arg2[%c0_5, %c0_6, %c0_7], %6 {strides = array<i32>} : memref<4x28x28xf32, #tpu.memory_space<vmem>>, vector<4x28x28xf32>,
    return
  }
  func.func @transform_0(%arg0: i32) -> (i32, i32, i32) {
    %c0_i32 = arith.constant 0 : i32
    %c0_i32_0 = arith.constant 0 : i32
    %c0_i32_1 = arith.constant 0 : i32
    return %arg0, %c0_i32, %c0_i32_0 : i32, i32, i32
  }
  func.func @transform_1(%arg0: i32) -> (i32, i32, i32) {
    %c0_i32 = arith.constant 0 : i32
    %c0_i32_0 = arith.constant 0 : i32
    %c0_i32_1 = arith.constant 0 : i32
    return %arg0, %c0_i32, %c0_i32_0 : i32, i32, i32
  }
}

</mosaic_0001>

<bundles_post_ra>
// kernel: tpu_custom_call.1
= control target key start
LH: loop header
LB: loop body
LE: loop exit
PB: predicated region body
PF: predicated region fallthrough
CT: control target
= control target key end

     0   :  { %6 = vsyncpa [#allocation3], 0  ;;  %s626_s0 = inlined_call_operand.hbm [shape: f32[8,16,16], index: 0, kind: input, shape index: {}]   ;;  %s627_s1 = inlined_call_operand.vmem [shape: f32[8,28,28], index: 1, kind: output, shape index: {}]  }
   0x1   :  { %8 = vsyncpa [#allocation3 + $0x1], 0  ;;  %s468_s6 = smov 0   ;;  %s470_s7 = smov 0  }
   0x2   :  { %s472_s8 = smov 0   ;;  %s474_s9 = smov 0  }
   0x3 LB: > { %s328_s10 = sadd.s32 4294967295, %s451_s9   ;;  %s488_s11 = sadd.s32 1, %s451_s9   ;;  %s451_s9 = sphi %s474_s9, %s636_s9   ;;  %s447_s8 = sphi %s472_s8, %s635_s8   ;;  %s443_s7 = sphi %s470_s7, %s634_s7   ;;  %s439_s6 = sphi %s468_s6, %s633_s6  }
   0x4   : > { %s18_s12 = ssub.s32 %s451_s9, %s488_s11  ;;  %s21_s13 = sadd.s32 1, %s447_s8 }
   0x5   : > { %p19_p0 = scmp.eq.s32.totalorder %s18_s12, 0  ;;  %p28_p1 = scmp.ne.s32.totalorder %s447_s8, %s443_s7 }
   0x6   : > { %p29_p2 = scmp.eq.s32.totalorder %s451_s9, 0  ;;  %p34_p3 = scmp.ne.s32.totalorder %s443_s7, %s439_s6 }
   0x7   : > { %s498_s14 = scalar_select %p19_p0, %s447_s8, %s21_s13  }
   0x8   : > { %p30_p4 = por %p29_p2, %p28_p1  ;;  %p35_p5 = scmp.eq.s32.totalorder %s328_s10, 0 }
   0x9   : > { %p352_p6 = scmp.lt.s32.totalorder %s451_s9, 2  ;;  %s84_s16 = sand.u32 1, %s447_s8  }
   0xa   : > { %p503_p7 = por %p35_p5, %p34_p3  ;;  %s332_s17 = sshll.u32 %s84_s16, 6 }
   0xb   : > { %s344_s18 = sshll.u32 %s451_s9, 10  ;;  %s88_s22 = scalar_lea.vmem [#allocation2], %s332_s17 }
   0xc   : > { %s629_s15 = scalar_select %p503_p7, 1, 0 }
   0xd   : > { %s512_s21 = scalar_lea.hbm %s626_s0, %s344_s18  ;;  %s96_s23 = sshll.u32 %s88_s22, 4  ;;  %s514_s23 = int_to_ptr.vmem [resolvable:$true] %s96_s23 }
   0xe   : > { %p516_p8 = pnand %p352_p6, %p30_p4  ;;  %s521_s25 = scalar_lea.sflag [#allocation3], %s84_s16 }
   0xf   : > { %s389_s26 = scalar_lea.hbm %s512_s21, 1024  ;;  %s394_s29 = scalar_lea.hbm %s626_s0, 2048 }
  0x10   : > { %p390_p10 = scmp.ne.s32.totalorder %s512_s21, %s389_s26  ;;  %p391_p11 = pneg %p516_p8 }
  0x11   : > { %p395_p0 = scmp.lt.s32.totalorder %s512_s21, %s626_s0  ;;  %p396_p1 = scmp.lt.s32.totalorder %s394_s29, %s389_s26 }
  0x12   : > { %p392_p12 = pnand %p391_p11, %p390_p10 }
  0x13   : > { %p397_p2 = por %p396_p1, %p395_p0 }
  0x14   : > { %p393_p13 = pneg %p392_p12 }
  0x16   : > { %p398_p3 = pnand %p397_p2, %p393_p13 }
  0x18   : > { %401 = shalt.err (!%p398_p3)
}
  0x19   : > { %s402_s3 = scalar_lea.vmem %s514_s23, 1024  ;;  %s453_s4 = smov [#allocation2]  }
  0x1a   : > { %p403_p4 = scmp.ne.s32.totalorder %s514_s23, %s402_s3  ;;  %s407_s5 = sshll.u32 %s453_s4, 4  ;;  %s408_s5 = int_to_ptr.vmem [resolvable:$false] %s407_s5 }
  0x1b   : > { %s409_s6 = scalar_lea.vmem %s408_s5, 2048  ;;  %p410_p10 = scmp.lt.s32.totalorder %s514_s23, %s408_s5 }
  0x1c   : > { %p405_p5 = pnand %p403_p4, %p391_p11  ;;  %p411_p12 = scmp.lt.s32.totalorder %s409_s6, %s402_s3 }
  0x1e   : > { %p406_p6 = pneg %p405_p5  ;;  %p412_p9 = por %p411_p12, %p410_p10 }
  0x20   : > { %p413_p7 = pnand %p412_p9, %p406_p6 }
  0x22   : > { %416 = shalt.err (!%p413_p7)
}
  0x23   : > { %s454_s12 = smov 128   ;;  %s455_s13 = smov 8  }
  0x24   : > { %351 = dma.hbm_to_vmem [thread:$0]  (!%p516_p8), %s512_s21, 1024, %s514_s23, %s521_s25, %s454_s12, %s454_s12, %s455_s13  }
  0x25   : > { %p104_p11 = scmp.lt.s32.totalorder %s451_s9, 3  ;;  %p631_p13 = scmp.ge.s32.totalorder %s451_s9, 1 }
  0x27   : > { %p105_p0 = pnand %p631_p13, %p104_p11 }
  0x28   : > { %s110_s16 = sand.u32 (!%p105_p0), 1, %s443_s7   ;;  %p632_p7 = scmp.ne.s32.totalorder (!%p105_p0), %s629_s15, 0 }
  0x29   : > { %108 = sbr.rel (%p105_p0) target bundleno = 183 (0xb7), region = 24  ;;  %s337_s17 = sshll.u32 (!%p105_p0), %s110_s16, 6 }
  0x2a   : > { %s111_s18 = scalar_lea.sflag (!%p105_p0), [#allocation3], %s110_s16  ;;  %s114_s19 = scalar_lea.vmem (!%p105_p0), [#allocation2], %s337_s17 }
  0x2e   : > { %434 = dma.done.wait (%p632_p7), %s111_s18, 1024  }
  0x2f   : > { %436 = vsyncadd (%p632_p7), %s111_s18, 4294966272  ;;  %s338_s20 = sshll.u32 %s328_s10, 2  ;;  %vm245_vm0 = vcmask 224256   ;;  %v144_v0 = vld [vmem:[%s114_s19 + $0x10] sm:$0xff]  ;;  %v142_v1 = vld [vmem:[%s114_s19] sm:$0xff]  ;;  %v456_v2 = vmov 0.0  }
  0x30   : > { %p136_p9 = scmp.lt.s32.totalorder %s338_s20, 7  ;;  %s457_s15 = smov 6   ;;  %v145_v3 = vld [vmem:[%s114_s19 + $0x18] sm:$0xff]  ;;  %v143_v4 = vld [vmem:[%s114_s19 + $0x8] sm:$0xff]  ;;  %v146_v6 = vld [vmem:[%s114_s19 + $0x20] sm:$0xff]  ;;  %vm182_vm1 = vcmask 48128  }
  0x31   : > { %162 = vrot.lane.b32.xlu1 %v144_v0, %s457_s15  ;;  %158 = vrot.lane.b32.xlu0 %v142_v1, %s457_s15  ;;  %v147_v5 = vld [vmem:[%s114_s19 + $0x28] sm:$0xff]  ;;  %v149_v7 = vld [vmem:[%s114_s19 + $0x38] sm:$0xff]  ;;  %vm191_vm2 = vcmask 179200   ;;  %vm208_vm3 = vcmask 1045504   ;;  %vm241_vm4 = vcmask 228352  }
  0x32   : > { %s638_s20 = smov (!%p136_p9, %s338_s20), 7  ;;  %v148_v8 = vld [vmem:[%s114_s19 + $0x30] sm:$0xff] }
  0x33   : > { %s345_s21 = sshll.u32 %s638_s20, 5 }
  0x34   : > { %s555_s24 = scalar_lea.vmem %s627_s1, %s345_s21 }
  0x35   : > { %246 = vst.msk [vmem:[%s555_s24 + $0x18] sm:$0xf] %vm245_vm0, %v456_v2  ;;  %250 = vst.msk [vmem:[%s555_s24 + $0x38] sm:$0xf] %vm245_vm0, %v456_v2  ;;  %164 = vrot.lane.b32.xlu1 %v145_v3, %s457_s15  ;;  %160 = vrot.lane.b32.xlu0 %v143_v4, %s457_s15 }
  0x36   : > { %254 = vst.msk [vmem:[%s555_s24 + $0x58] sm:$0xf] %vm245_vm0, %v456_v2  ;;  %258 = vst.msk [vmem:[%s555_s24 + $0x78] sm:$0xf] %vm245_vm0, %v456_v2 }
  0x39   : > { %168 = vrot.lane.b32.xlu1 %v147_v5, %s457_s15  ;;  %166 = vrot.lane.b32.xlu0 %v146_v6, %s457_s15 }
  0x3d   : > { %172 = vrot.lane.b32.xlu1 %v149_v7, %s457_s15  ;;  %170 = vrot.lane.b32.xlu0 %v148_v8, %s457_s15 }
  0xa3   : > { %v163_v9 = vpop.permute.xlu1 %162  ;;  %v159_v10 = vpop.permute.xlu0 %158 }
  0xa4   : > { %v185_v11 = vsel %vm182_vm1, 0.0, %v163_v9  ;;  %v183_v12 = vsel %vm182_vm1, 0.0, %v159_v10 }
  0xa5   : > { %v194_v13 = vsel %vm191_vm2, %v185_v11, 0.0  ;;  %v192_v14 = vsel %vm191_vm2, %v183_v12, 0.0 }
  0xa6   : > { %v212_v15 = vrot.slane %v194_v13, 2  ;;  %v209_v16 = vrot.slane %v192_v14, 2 }
  0xa7   : > { %v165_v17 = vpop.permute.xlu1 %164  ;;  %v161_v18 = vpop.permute.xlu0 %160 }
  0xa8   : > { %v234_v19 = vsel %vm208_vm3, 0.0, %v212_v15  ;;  %v233_v20 = vsel %vm208_vm3, 0.0, %v209_v16  ;;  %v186_v21 = vsel %vm182_vm1, 0.0, %v165_v17  ;;  %v184_v22 = vsel %vm182_vm1, 0.0, %v161_v18 }
  0xa9   : > { %242 = vst.msk [vmem:[%s555_s24] sm:$0xff] %vm241_vm4, %v233_v20  ;;  %v195_v23 = vsel %vm191_vm2, %v186_v21, 0.0  ;;  %v193_v24 = vsel %vm191_vm2, %v184_v22, 0.0  ;;  %247 = vst.msk [vmem:[%s555_s24 + $0x20] sm:$0xff] %vm241_vm4, %v234_v19 }
  0xaa   : > { %v213_v25 = vrot.slane %v195_v23, 2  ;;  %v210_v26 = vrot.slane %v193_v24, 2 }
  0xab   : > { %v169_v27 = vpop.permute.xlu1 %168  ;;  %v167_v28 = vpop.permute.xlu0 %166 }
  0xac   : > { %v214_v29 = vsel %vm208_vm3, %v212_v15, %v213_v25  ;;  %v238_v30 = vsel %vm208_vm3, %v213_v25, 0.0  ;;  %v211_v31 = vsel %vm208_vm3, %v209_v16, %v210_v26  ;;  %v237_v32 = vsel %vm208_vm3, %v210_v26, 0.0 }
  0xad   : > { %243 = vst.msk [vmem:[%s555_s24 + $0x8] sm:$0xff] %vm241_vm4, %v211_v31  ;;  %244 = vst.msk [vmem:[%s555_s24 + $0x10] sm:$0xff] %vm241_vm4, %v237_v32  ;;  %v188_v33 = vsel %vm182_vm1, 0.0, %v169_v27  ;;  %v187_v34 = vsel %vm182_vm1, 0.0, %v167_v28 }
  0xae   : > { %248 = vst.msk [vmem:[%s555_s24 + $0x28] sm:$0xff] %vm241_vm4, %v214_v29  ;;  %249 = vst.msk [vmem:[%s555_s24 + $0x30] sm:$0xff] %vm241_vm4, %v238_v30  ;;  %v197_v35 = vsel %vm191_vm2, %v188_v33, 0.0  ;;  %v196_v36 = vsel %vm191_vm2, %v187_v34, 0.0 }
  0xaf   : > { %v216_v37 = vrot.slane %v197_v35, 2  ;;  %v215_v38 = vrot.slane %v196_v36, 2  ;;  %v173_v39 = vpop.permute.xlu1 %172  ;;  %v171_v40 = vpop.permute.xlu0 %170 }
  0xb0   : > { %v190_v41 = vsel %vm182_vm1, 0.0, %v173_v39  ;;  %v189_v42 = vsel %vm182_vm1, 0.0, %v171_v40 }
  0xb1   : > { %v239_v43 = vsel %vm208_vm3, %v216_v37, 0.0  ;;  %v217_v44 = vsel %vm208_vm3, %v215_v38, %v216_v37  ;;  %v235_v45 = vsel %vm208_vm3, 0.0, %v215_v38  ;;  %v199_v46 = vsel %vm191_vm2, %v190_v41, 0.0 }
  0xb2   : > { %253 = vst.msk [vmem:[%s555_s24 + $0x50] sm:$0xff] %vm241_vm4, %v239_v43  ;;  %251 = vst.msk [vmem:[%s555_s24 + $0x40] sm:$0xff] %vm241_vm4, %v235_v45  ;;  %v219_v47 = vrot.slane %v199_v46, 2  ;;  %v198_v48 = vsel %vm191_vm2, %v189_v42, 0.0 }
  0xb3   : > { %252 = vst.msk [vmem:[%s555_s24 + $0x48] sm:$0xff] %vm241_vm4, %v217_v44  ;;  %v218_v49 = vrot.slane %v198_v48, 2 }
  0xb4   : > { %v240_v50 = vsel %vm208_vm3, %v219_v47, 0.0 }
  0xb5   : > { %257 = vst.msk [vmem:[%s555_s24 + $0x70] sm:$0xff] %vm241_vm4, %v240_v50  ;;  %v220_v51 = vsel %vm208_vm3, %v218_v49, %v219_v47  ;;  %v236_v52 = vsel %vm208_vm3, 0.0, %v218_v49 }
  0xb6   : > { %255 = vst.msk [vmem:[%s555_s24 + $0x60] sm:$0xff] %vm241_vm4, %v236_v52  ;;  %256 = vst.msk [vmem:[%s555_s24 + $0x68] sm:$0xff] %vm241_vm4, %v220_v51 }
  0xb7 PF: > { %p11_p8 = scmp.ge.s32.totalorder %s488_s11, 4   ;;  %s633_s6 = smov %s443_s7 }
  0xb8   : > { %s634_s7 = smov %s447_s8  ;;  %s635_s8 = smov %s498_s14 }
  0xb9   : > { %s636_s9 = smov %s488_s11  ;;  %13 = sbr.rel (!%p11_p8) target bundleno = 3 (0x3), region = 64 }
  0xbe   :  { %283 = vsyncpa [#allocation3], 1 }
  0xbf   :  { %285 = vsyncpa [#allocation3 + $0x1], 1 }

</bundles_post_ra>
